<compile_context>
chip_gen: v5e
topology: v5e:2x2
jax: 0.10.0
libtpu: 0.0.40
codegen_flags: <defaults>
</compile_context>

<pallas_src>
import functools

import numpy as np
import jax
import jax.numpy as jnp
from jax import lax
from jax.experimental import pallas as pl
from jax.experimental.pallas import tpu as pltpu

K = 9  # TurbulentMSE default kernel size for its DeltaConvLayer


def _gaussian_1d(k, sigma=3.0, truncate=4.0):
    """1-D factor of scipy.ndimage.gaussian_filter(delta_kxk, sigma) with scipy
    defaults (truncate=4.0, mode='reflect').  The module's 2-D weight is exactly
    outer(g, g) (scipy filters each axis independently), so it is separable."""
    radius = int(truncate * sigma + 0.5)
    x = np.arange(-radius, radius + 1, dtype=np.float64)
    phi = np.exp(-0.5 * (x / sigma) ** 2)
    phi /= phi.sum()
    delta = np.zeros(k, dtype=np.float64)
    delta[k // 2] = 1.0
    padded = np.pad(delta, radius, mode="symmetric")  # scipy 'reflect' boundary
    g = np.array([np.dot(padded[i:i + 2 * radius + 1], phi) for i in range(k)])
    return g.astype(np.float32)


def _axis_conv_matrix(g, size):
    """Return M (size, size) with M[o, i] = sum_{t : clip(o + t - p) == i} g[t].

    M @ X cross-correlates the columns of X with g under *replicate* padding;
    X @ M.T does the same along rows.  The index clamp folds the replicate
    padding into the matrix, so the kernel never needs a padded input.  Only
    static (numpy) indices are used, so this is jit/trace safe in g.
    (In a real module this is parameter-init-time work and can be cached.)"""
    g = jnp.asarray(g, jnp.float32)
    k = int(g.shape[0])
    p = k // 2
    o = np.arange(size)[:, None]
    t = np.arange(k)[None, :]
    src = np.clip(o + t - p, 0, size - 1)                       # (size, k), static
    onehot = jnp.asarray((src[..., None] == np.arange(size)).astype(np.float32))
    return jnp.einsum("t,otj->oj", g, onehot)                   # (size, size)


def _delta_mse_kernel(corr_ref, orig_ref, ah_ref, aw_ref, o_ref, *, C, H, W):
    # corr_ref / orig_ref : (1, C, H, W) f32 tiles of batch item n
    # ah_ref : (H, H)  height blur matrix (replicate padding folded in)
    # aw_ref : (W, W)  width  blur matrix (applied on the right)
    # o_ref  : (1, 1, 1) per-item sum of squared delta differences
    d = corr_ref[0] - orig_ref[0]                               # (C, H, W)

    # Width pass for all channels at once: fills the MXU M dim with C*H rows.
    dw = jnp.dot(d.reshape(C * H, W), aw_ref[...],
                 preferred_element_type=jnp.float32).reshape(C, H, W)

    sq = jnp.zeros((H, W), jnp.float32)
    for c in range(C):                                          # static unroll, C == 3
        blur_c = jnp.dot(ah_ref[...], dw[c],
                         preferred_element_type=jnp.float32)    # (H, W) = blur(d)[c]
        r = d[c] - blur_c                                       # delta residual
        sq = sq + r * r
    o_ref[0] = jnp.sum(sq, keepdims=True)                       # (1, 1) partial sum


def _delta_sq_sum(corr, orig, a_h, a_w):
    N, C, H, W = corr.shape
    kernel = functools.partial(_delta_mse_kernel, C=C, H=H, W=W)
    partial = pl.pallas_call(
        kernel,
        out_shape=jax.ShapeDtypeStruct((N, 1, 1), jnp.float32),
        grid=(N,),
        in_specs=[
            pl.BlockSpec((1, C, H, W), lambda n: (n, 0, 0, 0)),
            pl.BlockSpec((1, C, H, W), lambda n: (n, 0, 0, 0)),
            # constant block index -> stays VMEM-resident, no per-step re-DMA
            pl.BlockSpec((H, H), lambda n: (0, 0)),
            pl.BlockSpec((W, W), lambda n: (0, 0)),
        ],
        out_specs=pl.BlockSpec((1, 1, 1), lambda n: (n, 0, 0)),
        compiler_params=pltpu.CompilerParams(
            dimension_semantics=("parallel",)),
    )(corr, orig, a_h, a_w)
    return jnp.sum(partial)


def turbulent_delta_mse(orig, corr, g1d):
    """Fused mse2 = mean(((corr - blur(corr)) - (orig - blur(orig)))**2).
    Uses linearity of the bias-free depthwise blur: equals mean((d - blur(d))**2)
    with d = corr - orig, exactly."""
    N, C, H, W = corr.shape
    a_h = _axis_conv_matrix(g1d, H)            # applied on the left  (height)
    a_w = _axis_conv_matrix(g1d, W).T          # applied on the right (width)
    # f32 MXU operands kept on purpose: this is a loss / accuracy-sensitive path.
    s = _delta_sq_sum(corr.astype(jnp.float32), orig.astype(jnp.float32), a_h, a_w)
    return s / (N * C * H * W)


def turbulent_mse(orig, corr, g1d, beta=1.0):
    # TODO(synk): mse1 (self.meaner / mean_mse) and mse3 (station_interpolator,
    # orig_scaler, uvt_to_wt) depend on external modules not defined in the spec;
    # only the delta-MSE term (mse2) is computed here.
    return beta * turbulent_delta_mse(orig, corr, g1d)


if __name__ == "__main__":
    N, C, H, W = 2, 3, 16, 24
    key = jax.random.PRNGKey(0)
    k1, k2 = jax.random.split(key)
    corr = jax.random.normal(k1, (N, C, H, W), dtype=jnp.float32)
    orig = corr + 0.1 * jax.random.normal(k2, (N, C, H, W), dtype=jnp.float32)

    g = _gaussian_1d(K, sigma=3.0)
    mse2 = jax.block_until_ready(turbulent_mse(orig, corr, g, beta=1.0))

    # Pure-JAX reference: literal module math (depthwise 2-D conv, replicate pad,
    # two blurs, then the delta MSE).
    kk = np.outer(g, g).astype(np.float32)                      # per-channel weight
    w_oihw = jnp.asarray(np.broadcast_to(kk, (C, 1, K, K)).copy())
    p = K // 2

    def blur_ref(x):
        xp = jnp.pad(x, ((0, 0), (0, 0), (p, p), (p, p)), mode="edge")
        return lax.conv_general_dilated(
            xp, w_oihw, window_strides=(1, 1), padding="VALID",
            feature_group_count=C,
            dimension_numbers=("NCHW", "OIHW", "NCHW"))

    delta_corr = corr - blur_ref(corr)
    delta_orig = orig - blur_ref(orig)
    ref = jnp.mean((delta_corr - delta_orig) ** 2)

    assert mse2.shape == ()
    assert jnp.allclose(mse2, ref, atol=1e-5, rtol=1e-4), (float(mse2), float(ref))
    print("KERNEL_OK")
</pallas_src>

<mosaic_0001>
module attributes {stable_mosaic.version = 11 : i64} {
  func.func @_delta_mse_kernel(%arg0: i32, %arg1: memref<1x3x16x24xf32, #tpu.memory_space<vmem>>, %arg2: memref<1x3x16x24xf32, #tpu.memory_space<vmem>>, %arg3: memref<16x16xf32, #tpu.memory_space<vmem>>, %arg4: memref<24x24xf32, #tpu.memory_space<vmem>>, %arg5: memref<1x1x1xf32, #tpu.memory_space<vmem>>) attributes {dimension_semantics = [#tpu.dimension_semantics<parallel>], iteration_bounds = array<i64: 2>, scalar_prefetch = 0 : i64, scratch_operands = 0 : i64, tpu.core_type = #tpu.core_type<tc>, window_params = [{transform_indices = @transform_0, window_bounds = array<i64: 1, 3, 16, 24>}, {transform_indices = @transform_1, window_bounds = array<i64: 1, 3, 16, 24>}, {pipeline_mode = #tpu.pipeline_mode<synchronous>, transform_indices = @transform_2, window_bounds = array<i64: 16, 16>}, {pipeline_mode = #tpu.pipeline_mode<synchronous>, transform_indices = @transform_3, window_bounds = array<i64: 24, 24>}, {transform_indices = @transform_4, window_bounds = array<i64: 1, 1, 1>}]} {
    %c0 = arith.constant 0 : index
    %c0_0 = arith.constant 0 : index
    %c0_1 = arith.constant 0 : index
    %c0_2 = arith.constant 0 : index
    %0 = vector.load %arg1[%c0, %c0_0, %c0_1, %c0_2] : memref<1x3x16x24xf32, #tpu.memory_space<vmem>>, vector<1x3x16x24xf32>
    %1 = vector.shape_cast %0 : vector<1x3x16x24xf32> to vector<3x16x24xf32>
    %c0_3 = arith.constant 0 : index
    %c0_4 = arith.constant 0 : index
    %c0_5 = arith.constant 0 : index
    %c0_6 = arith.constant 0 : index
    %2 = vector.load %arg2[%c0_3, %c0_4, %c0_5, %c0_6] : memref<1x3x16x24xf32, #tpu.memory_space<vmem>>, vector<1x3x16x24xf32>
    %3 = vector.shape_cast %2 : vector<1x3x16x24xf32> to vector<3x16x24xf32>
    %4 = arith.subf %1, %3 : vector<3x16x24xf32>
    %5 = vector.shape_cast %4 : vector<3x16x24xf32> to vector<48x24xf32>
    %c0_7 = arith.constant 0 : index
    %c0_8 = arith.constant 0 : index
    %6 = vector.load %arg4[%c0_7, %c0_8] : memref<24x24xf32, #tpu.memory_space<vmem>>, vector<24x24xf32>
    %cst = arith.constant dense<0.000000e+00> : vector<48x24xf32>
    %7 = tpu.matmul %5, %6, %cst {dimension_numbers = #tpu.dot_dimension_numbers<[1], [0], [0], [1], [0, 0, 1, 1], [], []>} : vector<48x24xf32>, vector<24x24xf32>, vector<48x24xf32> -> vector<48x24xf32>
    %8 = vector.shape_cast %7 : vector<48x24xf32> to vector<3x16x24xf32>
    %cst_9 = arith.constant 0.000000e+00 : f32
    %9 = vector.broadcast %cst_9 : f32 to vector<16x24xf32>
    %c0_10 = arith.constant 0 : index
    %c0_11 = arith.constant 0 : index
    %10 = vector.load %arg3[%c0_10, %c0_11] : memref<16x16xf32, #tpu.memory_space<vmem>>, vector<16x16xf32>
    %11 = vector.extract_strided_slice %8 {offsets = [0, 0, 0], sizes = [1, 16, 24], strides = [1, 1, 1]} : vector<3x16x24xf32> to vector<1x16x24xf32>
    %12 = vector.shape_cast %11 : vector<1x16x24xf32> to vector<16x24xf32>
    %cst_12 = arith.constant dense<0.000000e+00> : vector<16x24xf32>
    %13 = tpu.matmul %10, %12, %cst_12 {dimension_numbers = #tpu.dot_dimension_numbers<[1], [0], [0], [1], [0, 0, 1, 1], [], []>} : vector<16x16xf32>, vector<16x24xf32>, vector<16x24xf32> -> vector<16x24xf32>
    %14 = vector.extract_strided_slice %4 {offsets = [0, 0, 0], sizes = [1, 16, 24], strides = [1, 1, 1]} : vector<3x16x24xf32> to vector<1x16x24xf32>
    %15 = vector.shape_cast %14 : vector<1x16x24xf32> to vector<16x24xf32>
    %16 = arith.subf %15, %13 : vector<16x24xf32>
    %17 = arith.mulf %16, %16 : vector<16x24xf32>
    %18 = arith.addf %9, %17 : vector<16x24xf32>
    %c0_13 = arith.constant 0 : index
    %c0_14 = arith.constant 0 : index
    %19 = vector.load %arg3[%c0_13, %c0_14] : memref<16x16xf32, #tpu.memory_space<vmem>>, vector<16x16xf32>
    %20 = vector.extract_strided_slice %8 {offsets = [1, 0, 0], sizes = [1, 16, 24], strides = [1, 1, 1]} : vector<3x16x24xf32> to vector<1x16x24xf32>
    %21 = vector.shape_cast %20 : vector<1x16x24xf32> to vector<16x24xf32>
    %cst_15 = arith.constant dense<0.000000e+00> : vector<16x24xf32>
    %22 = tpu.matmul %19, %21, %cst_15 {dimension_numbers = #tpu.dot_dimension_numbers<[1], [0], [0], [1], [0, 0, 1, 1], [], []>} : vector<16x16xf32>, vector<16x24xf32>, vector<16x24xf32> -> vector<16x24xf32>
    %23 = vector.extract_strided_slice %4 {offsets = [1, 0, 0], sizes = [1, 16, 24], strides = [1, 1, 1]} : vector<3x16x24xf32> to vector<1x16x24xf32>
    %24 = vector.shape_cast %23 : vector<1x16x24xf32> to vector<16x24xf32>
    %25 = arith.subf %24, %22 : vector<16x24xf32>
    %26 = arith.mulf %25, %25 : vector<16x24xf32>
    %27 = arith.addf %18, %26 : vector<16x24xf32>
    %c0_16 = arith.constant 0 : index
    %c0_17 = arith.constant 0 : index
    %28 = vector.load %arg3[%c0_16, %c0_17] : memref<16x16xf32, #tpu.memory_space<vmem>>, vector<16x16xf32>
    %29 = vector.extract_strided_slice %8 {offsets = [2, 0, 0], sizes = [1, 16, 24], strides = [1, 1, 1]} : vector<3x16x24xf32> to vector<1x16x24xf32>
    %30 = vector.shape_cast %29 : vector<1x16x24xf32> to vector<16x24xf32>
    %cst_18 = arith.constant dense<0.000000e+00> : vector<16x24xf32>
    %31 = tpu.matmul %28, %30, %cst_18 {dimension_numbers = #tpu.dot_dimension_numbers<[1], [0], [0], [1], [0, 0, 1, 1], [], []>} : vector<16x16xf32>, vector<16x24xf32>, vector<16x24xf32> -> vector<16x24xf32>
    %32 = vector.extract_strided_slice %4 {offsets = [2, 0, 0], sizes = [1, 16, 24], strides = [1, 1, 1]} : vector<3x16x24xf32> to vector<1x16x24xf32>
    %33 = vector.shape_cast %32 : vector<1x16x24xf32> to vector<16x24xf32>
    %34 = arith.subf %33, %31 : vector<16x24xf32>
    %35 = arith.mulf %34, %34 : vector<16x24xf32>
    %36 = arith.addf %27, %35 : vector<16x24xf32>
    %37 = vector.shape_cast %36 : vector<16x24xf32> to vector<1x16x24xf32>
    %cst_19 = arith.constant dense<0.000000e+00> : vector<1xf32>
    %38 = vector.multi_reduction <add>, %37, %cst_19 [1, 2] : vector<1x16x24xf32> to vector<1xf32>
    %39 = vector.shape_cast %38 : vector<1xf32> to vector<1x1x1xf32>
    %40 = vector.extract %39[0, 0, 0] : f32 from vector<1x1x1xf32>
    %41 = vector.broadcast %40 : f32 to vector<1x1xf32>
    %c0_20 = arith.constant 0 : index
    %c0_21 = arith.constant 0 : index
    %c0_22 = arith.constant 0 : index
    %42 = vector.load %arg5[%c0_20, %c0_21, %c0_22] : memref<1x1x1xf32, #tpu.memory_space<vmem>>, vector<1x1x1xf32>
    %43 = vector.shape_cast %42 : vector<1x1x1xf32> to vector<1x1xf32>
    %44 = vector.shape_cast %41 : vector<1x1xf32> to vector<1x1x1xf32>
    tpu.vector_store %arg5[%c0_20, %c0_21, %c0_22], %44 {strides = array<i32>} : memref<1x1x1xf32, #tpu.memory_space<vmem>>, vector<1x1x1xf32>,
    return
  }
  func.func @transform_0(%arg0: i32) -> (i32, i32, i32, i32) {
    %c0_i32 = arith.constant 0 : i32
    %c0_i32_0 = arith.constant 0 : i32
    %c0_i32_1 = arith.constant 0 : i32
    %c0_i32_2 = arith.constant 0 : i32
    return %arg0, %c0_i32, %c0_i32_0, %c0_i32_1 : i32, i32, i32, i32
  }
  func.func @transform_1(%arg0: i32) -> (i32, i32, i32, i32) {
    %c0_i32 = arith.constant 0 : i32
    %c0_i32_0 = arith.constant 0 : i32
    %c0_i32_1 = arith.constant 0 : i32
    %c0_i32_2 = arith.constant 0 : i32
    return %arg0, %c0_i32, %c0_i32_0, %c0_i32_1 : i32, i32, i32, i32
  }
  func.func @transform_2(%arg0: i32) -> (i32, i32) {
    %c0_i32 = arith.constant 0 : i32
    %c0_i32_0 = arith.constant 0 : i32
    %c0_i32_1 = arith.constant 0 : i32
    return %c0_i32, %c0_i32_0 : i32, i32
  }
  func.func @transform_3(%arg0: i32) -> (i32, i32) {
    %c0_i32 = arith.constant 0 : i32
    %c0_i32_0 = arith.constant 0 : i32
    %c0_i32_1 = arith.constant 0 : i32
    return %c0_i32, %c0_i32_0 : i32, i32
  }
  func.func @transform_4(%arg0: i32) -> (i32, i32, i32) {
    %c0_i32 = arith.constant 0 : i32
    %c0_i32_0 = arith.constant 0 : i32
    %c0_i32_1 = arith.constant 0 : i32
    return %arg0, %c0_i32, %c0_i32_0 : i32, i32, i32
  }
}

</mosaic_0001>

<bundles_post_ra>
// kernel: tpu_custom_call.1
= control target key start
LH: loop header
LB: loop body
LE: loop exit
PB: predicated region body
PF: predicated region fallthrough
CT: control target
= control target key end

     0   :  { %9 = vsyncpa [#allocation3], 0  ;;  %s1053_s0 = inlined_call_operand.hbm [shape: f32[2,3,16,24], index: 0, kind: input, shape index: {}]   ;;  %s1054_s1 = inlined_call_operand.hbm [shape: f32[2,3,16,24], index: 1, kind: input, shape index: {}]   ;;  %s1055_s2 = inlined_call_operand.hbm [shape: f32[16,16], index: 2, kind: input, shape index: {}]   ;;  %s1056_s3 = inlined_call_operand.hbm [shape: f32[24,24], index: 3, kind: input, shape index: {}]   ;;  %s1057_s4 = inlined_call_operand.vmem [shape: f32[2,1,1], index: 4, kind: output, shape index: {}]  }
   0x1   :  { %11 = vsyncpa [#allocation3 + $0x1], 0 }
   0x2   :  { %12 = vsyncpa [#allocation5], 0 }
   0x3   :  { %14 = vsyncpa [#allocation5 + $0x1], 0 }
   0x4   :  { %15 = vsyncpa [#allocation8], 0  ;;  %s878_s15 = smov 0   ;;  %s880_s16 = smov 0  }
   0x5   :  { %s882_s17 = smov 0   ;;  %s884_s18 = smov 0  }
   0x6 LB: > { %s897_s19 = sadd.s32 4294967295, %s847_s18   ;;  %p41_p0 = scmp.ne.s32.totalorder %s839_s16, %s835_s15  ;;  %s847_s18 = sphi %s884_s18, %s1064_s18   ;;  %s843_s17 = sphi %s882_s17, %s1063_s17   ;;  %s839_s16 = sphi %s880_s16, %s1062_s16   ;;  %s835_s15 = sphi %s878_s15, %s1061_s15  }
   0x7   : > { %p42_p1 = scmp.eq.s32.totalorder %s897_s19, 0  ;;  %p579_p2 = scmp.ge.s32.totalorder %s847_s18, 1 }
   0x8   : > { %p146_p3 = scmp.lt.s32.totalorder %s847_s18, 3  ;;  %s157_s23 = sshll.u32 %s1055_s2, 4  ;;  %s158_s23 = int_to_ptr.hbm [resolvable:$true] %s157_s23 }
   0x9   : > { %p905_p4 = por %p42_p1, %p41_p0  ;;  %s849_s25 = smov [#allocation6]  }
   0xa   : > { %p912_p5 = pnand %p579_p2, %p146_p3  ;;  %s159_s26 = sshll.u32 %s849_s25, 4  ;;  %s160_s26 = int_to_ptr.vmem [resolvable:$true] %s159_s26 }
   0xb   : > { %s171_s29 = sshll.u32 %s1056_s3, 4  ;;  %s850_s30 = smov 128   ;;  %s172_s29 = int_to_ptr.hbm [resolvable:$true] %s171_s29 }
   0xc   : > { %p626_p6 = pneg %p912_p5  ;;  %s851_s5 = smov 8  }
   0xd   : > { %s852_s6 = smov [#allocation7]   ;;  %s930_s8 = sadd.s32 1, %s847_s18  }
   0xe   : > { %p627_p7 = pnand %p626_p6, %p42_p1  ;;  %s173_s7 = sshll.u32 %s852_s6, 4  ;;  %s174_s7 = int_to_ptr.vmem [resolvable:$true] %s173_s7 }
   0xf   : > { %s28_s9 = sadd.s32 1, %s843_s17  ;;  %s25_s10 = ssub.s32 %s847_s18, %s930_s8 }
  0x10   : > { %629 = dma.hbm_to_vmem [thread:$0]  (!%p627_p7), %s158_s23, 256, %s160_s26, [#allocation5], %s850_s30, %s850_s30, %s851_s5  }
  0x11   : > { %632 = dma.hbm_to_vmem [thread:$0]  (!%p627_p7), %s172_s29, 384, %s174_s7, [#allocation8], %s850_s30, %s850_s30, %s851_s5  }
  0x12   : > { %p35_p8 = scmp.ne.s32.totalorder %s843_s17, %s839_s16  ;;  %p26_p9 = scmp.eq.s32.totalorder %s25_s10, 0 }
  0x13   : > { %p36_p10 = scmp.eq.s32.totalorder %s847_s18, 0  ;;  %p642_p11 = scmp.lt.s32.totalorder %s847_s18, 2 }
  0x14   : > { %s187_s11 = sand.u32 1, %s843_s17   ;;  %s209_s14 = sand.u32 1, %s847_s18  }
  0x15   : > { %s941_s12 = scalar_select %p26_p9, %s843_s17, %s28_s9  }
  0x16   : > { %p37_p12 = por %p36_p10, %p35_p8  ;;  %s943_s13 = smul.u32 48, %s187_s11 }
  0x17   : > { %s608_s15 = smul.u32 48, %s847_s18  ;;  %s188_s29 = scalar_lea.sflag [#allocation3], %s187_s11 }
  0x18   : > { %p947_p13 = pnand %p642_p11, %p37_p12  ;;  %s191_s26 = scalar_lea.vmem [#allocation2], %s943_s13 }
  0x19   : > { %s196_s25 = scalar_lea.hbm %s1053_s0, %s608_s15  ;;  %s199_s27 = sshll.u32 %s191_s26, 4  ;;  %s200_s27 = int_to_ptr.vmem [resolvable:$true] %s199_s27 }
  0x1a   : > { %s197_s28 = sshll.u32 %s196_s25, 4  ;;  %p745_p2 = pneg %p947_p13  ;;  %s198_s28 = int_to_ptr.hbm [resolvable:$true] %s197_s28 }
  0x1b   : > { %s741_s6 = sshra.s32 %s198_s28, 4  ;;  %s748_s22 = scalar_lea.hbm %s1053_s0, 96  ;;  %s742_s6 = int_to_ptr.hbm [resolvable:$true] %s741_s6 }
  0x1c   : > { %s743_s7 = scalar_lea.hbm %s742_s6, 48  ;;  %p749_p7 = scmp.lt.s32.totalorder %s742_s6, %s1053_s0 }
  0x1d   : > { %p744_p0 = scmp.ne.s32.totalorder %s742_s6, %s743_s7  ;;  %p750_p8 = scmp.lt.s32.totalorder %s748_s22, %s743_s7 }
  0x1f   : > { %p746_p3 = pnand %p745_p2, %p744_p0  ;;  %p751_p9 = por %p750_p8, %p749_p7 }
  0x21   : > { %p747_p6 = pneg %p746_p3 }
  0x23   : > { %p752_p10 = pnand %p751_p9, %p747_p6 }
  0x25   : > { %755 = shalt.err (!%p752_p10)
}
  0x26   : > { %636 = dma.hbm_to_vmem [thread:$0]  (!%p947_p13), %s198_s28, 768, %s200_s27, %s188_s29, %s850_s30, %s850_s30, %s851_s5  }
  0x27   : > { %s218_s9 = scalar_lea.hbm %s1054_s1, %s608_s15  ;;  %s213_s23 = scalar_lea.vmem [#allocation4], %s943_s13 }
  0x28   : > { %s219_s10 = sshll.u32 %s218_s9, 4  ;;  %s221_s6 = sshll.u32 %s213_s23, 4  ;;  %s220_s10 = int_to_ptr.hbm [resolvable:$true] %s219_s10  ;;  %s222_s6 = int_to_ptr.vmem [resolvable:$true] %s221_s6 }
  0x29   : > { %s210_s7 = scalar_lea.sflag [#allocation5], %s209_s14  ;;  %s771_s22 = sshra.s32 %s220_s10, 4  ;;  %s772_s22 = int_to_ptr.hbm [resolvable:$true] %s771_s22 }
  0x2a   : > { %s773_s26 = scalar_lea.hbm %s772_s22, 48  ;;  %s778_s29 = scalar_lea.hbm %s1054_s1, 96 }
  0x2b   : > { %p774_p11 = scmp.ne.s32.totalorder %s772_s22, %s773_s26  ;;  %p779_p3 = scmp.lt.s32.totalorder %s772_s22, %s1054_s1 }
  0x2c   : > { %p780_p6 = scmp.lt.s32.totalorder %s778_s29, %s773_s26 }
  0x2d   : > { %p776_p12 = pnand %p774_p11, %p745_p2 }
  0x2e   : > { %p781_p7 = por %p780_p6, %p779_p3 }
  0x2f   : > { %p777_p0 = pneg %p776_p12 }
  0x31   : > { %p782_p8 = pnand %p781_p7, %p777_p0 }
  0x33   : > { %785 = shalt.err (!%p782_p8)
}
  0x34   : > { %639 = dma.hbm_to_vmem [thread:$0]  (!%p947_p13), %s220_s10, 768, %s222_s6, %s210_s7, %s850_s30, %s850_s30, %s851_s5  }
  0x35   : > { %233 = sbr.rel (%p912_p5) target bundleno = 548 (0x224), region = 36  ;;  %s235_s18 = sand.u32 (!%p912_p5), 1, %s839_s16  }
  0x36   : > { %s611_s13 = smul.u32 (!%p912_p5), 48, %s235_s18  ;;  %s236_s14 = scalar_lea.sflag (!%p912_p5), [#allocation3], %s235_s18 }
  0x38   : > { %s994_s25 = scalar_lea.vmem (!%p912_p5), [#allocation2], %s611_s13 }
  0x3a   : > { %818 = dma.done.wait (%p905_p4), %s236_s14, 768  }
  0x3b   : > { %820 = vsyncadd (%p905_p4), %s236_s14, 4294966528  ;;  %s245_s21 = sand.u32 1, %s897_s19   ;;  %s1001_s30 = scalar_lea.vmem [#allocation4], %s611_s13 }
  0x3c   : > { %s246_s9 = scalar_lea.sflag [#allocation5], %s245_s21 }
  0x3d   : > { %822 = dma.done.wait (%p905_p4), %s246_s9, 768  }
  0x3e   : > { %824 = vsyncadd (%p905_p4), %s246_s9, 4294966528 }
  0x3f   : > { %826 = dma.done.wait (%p42_p1), [#allocation5], 256  }
  0x40   : > { %828 = vsyncadd (%p42_p1), [#allocation5], 4294967040 }
  0x41   : > { %830 = dma.done.wait (%p42_p1), [#allocation8], 384  }
  0x42   : > { %832 = vsyncadd (%p42_p1), [#allocation8], 4294966912  ;;  %v311_v0 = vld [vmem:[#allocation7 + $0x10] sm:$0xff]  ;;  %v310_v1 = vld [vmem:[#allocation7 + $0x8] sm:$0xff]  ;;  %vm312_vm0 = vcmask 195584   ;;  %vm368_vm1 = vcmask 130048  }
  0x43   : > { %344 = vmatpush.msra.mxu0 %v311_v0  ;;  %602 = vmatpush.msra.mxu1 %v311_v0  ;;  %v291_v2 = vld [vmem:[%s994_s25] sm:$0xff]  ;;  %v294_v4 = vld [vmem:[%s994_s25 + $0x18] sm:$0xff]  ;;  %v292_v9 = vld [vmem:[%s994_s25 + $0x8] sm:$0xff]  ;;  %p288_p1 = scmp.lt.s32.totalorder %s897_s19, 1  ;;  %vm475_vm2 = vcmask 0  }
  0x44   : > { %v297_v3 = vld [vmem:[%s1001_s30] sm:$0xff]  ;;  %v300_v7 = vld [vmem:[%s1001_s30 + $0x18] sm:$0xff]  ;;  %v298_v10 = vld [vmem:[%s1001_s30 + $0x8] sm:$0xff] }
  0x45   : > { %v309_v5 = vld [vmem:[#allocation7] sm:$0xff]  ;;  %v303_v6 = vsub.f32 %v291_v2, %v297_v3  ;;  %345 = vmatpush.msra.mxu0 %v310_v1  ;;  %603 = vmatpush.msra.mxu1 %v310_v1  ;;  %v306_v8 = vsub.f32 %v294_v4, %v300_v7  ;;  %v304_v13 = vsub.f32 %v292_v9, %v298_v10  ;;  %v296_v15 = vld [vmem:[%s994_s25 + $0x28] sm:$0xff]  ;;  %v366_v25 = vld [vmem:[#allocation6] sm:$0xff]  ;;  %s1066_s19 = smov (!%p288_p1, %s897_s19), 1 }
  0x46   : > { %v295_v11 = vld [vmem:[%s994_s25 + $0x20] sm:$0xff]  ;;  %v302_v16 = vld [vmem:[%s1001_s30 + $0x28] sm:$0xff]  ;;  %v293_v17 = vld [vmem:[%s994_s25 + $0x10] sm:$0xff]  ;;  %s290_s5 = scalar_lea.vmem %s1057_s4, %s1066_s19 }
  0x47   : > { %346 = vmatpush.msra.mxu0 %v309_v5  ;;  %604 = vmatpush.msra.mxu1 %v309_v5  ;;  %v301_v12 = vld [vmem:[%s1001_s30 + $0x20] sm:$0xff]  ;;  %v299_v18 = vld [vmem:[%s1001_s30 + $0x10] sm:$0xff]  ;;  %v308_v19 = vsub.f32 %v296_v15, %v302_v16  ;;  %v367_v26 = vld [vmem:[#allocation6 + $0x8] sm:$0xff] }
  0x48   : > { %588 = vmatmul.msk.f32.vlgmr.msra.gmra.mxu0 %vm312_vm0, %v303_v6  ;;  %591 = vmatmul.msk.f32.vlgmr.msra.gmra.mxu1 %vm312_vm0, %v306_v8  ;;  %v307_v14 = vsub.f32 %v295_v11, %v301_v12  ;;  %v305_v20 = vsub.f32 %v293_v17, %v299_v18 }
  0x50   : > { %589 = vmatmul.msk.f32.gmra.mxu0 %vm312_vm0, %v304_v13  ;;  %592 = vmatmul.msk.f32.gmra.mxu1 %vm312_vm0, %v307_v14 }
  0x58   : > { %593 = vmatmul.msk.f32.gmra.mxu1 %vm312_vm0, %v308_v19  ;;  %590 = vmatmul.msk.f32.gmra.mxu0 %vm312_vm0, %v305_v20 }
  0xc5   : > { %v348_v21 = vpop.f32.mrf.mxu0  ;;  %v357_v22 = vpop.f32.mrf.mxu1 }
  0xcd   : > { %v351_v23 = vpop.f32.mrf.mxu0  ;;  %v360_v24 = vpop.f32.mrf.mxu1 }
  0xce   : > { %389 = vmatpush.msra.mxu2 %v351_v23  ;;  %605 = vmatpush.msra.mxu3 %v351_v23 }
  0xd0   : > { %390 = vmatpush.msra.mxu2 %v348_v21  ;;  %606 = vmatpush.msra.mxu3 %v348_v21 }
  0xd1   : > { %594 = vmatmul.msk.f32.vlgmr.msra.gmra.mxu2 %vm368_vm1, %v366_v25  ;;  %595 = vmatmul.msk.f32.vlgmr.msra.gmra.mxu3 %vm368_vm1, %v367_v26 }
  0xd2   : > { %418 = vmatpush.msrb.mxu2 %v357_v22 }
  0xd5   : > { %v363_v27 = vpop.f32.mrf.mxu1  ;;  %v354_v28 = vpop.f32.mrf.mxu0 }
  0xd6   : > { %447 = vmatpush.msrb.mxu3 %v363_v27  ;;  %419 = vmatpush.msrb.mxu2 %v354_v28 }
  0xd8   : > { %448 = vmatpush.msrb.mxu3 %v360_v24 }
  0xd9   : > { %596 = vmatmul.msk.f32.vlgmr.msrb.gmra.mxu2 %vm368_vm1, %v366_v25  ;;  %598 = vmatmul.msk.f32.vlgmr.msrb.gmra.mxu3 %vm368_vm1, %v366_v25 }
  0xe1   : > { %597 = vmatmul.msk.f32.gmra.mxu2 %vm368_vm1, %v367_v26  ;;  %599 = vmatmul.msk.f32.gmra.mxu3 %vm368_vm1, %v367_v26 }
 0x154   : > { %v392_v29 = vpop.f32.mrf.mxu2  ;;  %v395_v30 = vpop.f32.mrf.mxu3 }
 0x155   : > { %v398_v34 = vsub.f32 %v303_v6, %v392_v29  ;;  %v399_v38 = vsub.f32 %v304_v13, %v395_v30 }
 0x157   : > { %v400_v37 = vmul.f32 %v398_v34, %v398_v34  ;;  %v401_v45 = vmul.f32 %v399_v38, %v399_v38 }
 0x15c   : > { %v421_v31 = vpop.f32.mrf.mxu2  ;;  %v450_v32 = vpop.f32.mrf.mxu3 }
 0x15d   : > { %v427_v33 = vsub.f32 %v305_v20, %v421_v31  ;;  %v456_v36 = vsub.f32 %v307_v14, %v450_v32 }
 0x15f   : > { %v429_v35 = vmul.f32 %v427_v33, %v427_v33  ;;  %v458_v42 = vmul.f32 %v456_v36, %v456_v36 }
 0x161   : > { %v431_v41 = vadd.f32 %v429_v35, %v400_v37 }
 0x163   : > { %v460_v49 = vadd.f32 %v458_v42, %v431_v41 }
 0x164   : > { %v424_v39 = vpop.f32.mrf.mxu2  ;;  %v453_v40 = vpop.f32.mrf.mxu3 }
 0x165   : > { %v428_v43 = vsub.f32 %v306_v8, %v424_v39  ;;  %v457_v44 = vsub.f32 %v308_v19, %v453_v40  ;;  %v462_v51 = vsel %vm312_vm0, %v460_v49, 0.0 }
 0x167   : > { %v430_v46 = vmul.f32 %v428_v43, %v428_v43  ;;  %v459_v47 = vmul.f32 %v457_v44, %v457_v44 }
 0x169   : > { %v432_v48 = vadd.f32 %v430_v46, %v401_v45 }
 0x16b   : > { %v461_v50 = vadd.f32 %v459_v47, %v432_v48 }
 0x16d   : > { %v463_v52 = vsel %vm312_vm0, %v461_v50, 0.0 }
 0x16e   : > { %v464_v53 = vadd.f32 %v463_v52, %v462_v51 }
 0x170   : > { %465 = vadd.xlane.f32.xlu0 %v464_v53 }
 0x1e3   : > { %v466_v54 = vpop.xlane.xlu0 %465 }
 0x1e4   : > { %v467_v55 = vrot.slane %v466_v54, 4 }
 0x1e6   : > { %v468_v56 = vadd.f32 %v467_v55, %v466_v54 }
 0x1e8   : > { %v469_v57 = vrot.slane %v468_v56, 2 }
 0x1ea   : > { %v470_v58 = vadd.f32 %v469_v57, %v468_v56 }
 0x1ec   : > { %v471_v59 = vrot.slane %v470_v58, 1 }
 0x1ee   : > { %v472_v60 = vadd.f32 %v471_v59, %v470_v58 }
 0x1f0   : > { %612 = vpush %v472_v60 }
 0x221   : > { %s613_s10 = spop %612 }
 0x222   : > { %v474_v61 = vstv %s613_s10 }
 0x223   : > { %476 = vst.msk [vmem:[%s290_s5] sm:$0x1] %vm475_vm2, %v474_v61 }
 0x224 PF: > { %p18_p4 = scmp.ge.s32.totalorder %s930_s8, 4   ;;  %s1061_s15 = smov %s839_s16 }
 0x225   : > { %s1062_s16 = smov %s843_s17  ;;  %s1063_s17 = smov %s941_s12 }
 0x226   : > { %s1064_s18 = smov %s930_s8  ;;  %20 = sbr.rel (!%p18_p4) target bundleno = 6 (0x6), region = 97 }
 0x22b   :  { %494 = vsyncpa [#allocation3], 1 }
 0x22c   :  { %496 = vsyncpa [#allocation3 + $0x1], 1 }
 0x22d   :  { %497 = vsyncpa [#allocation5], 1 }
 0x22e   :  { %499 = vsyncpa [#allocation5 + $0x1], 1 }
 0x22f   :  { %500 = vsyncpa [#allocation8], 1 }

</bundles_post_ra>
